<compile_context>
chip_gen: v7x
topology: tpu7x:2x2x1
jax: 0.10.0
libtpu: 0.0.40
codegen_flags: <defaults>
</compile_context>

<pallas_src>
import functools
import math

import jax
import jax.numpy as jnp
from jax import lax
from jax.experimental import pallas as pl
from jax.experimental.pallas import tpu as pltpu

_INV_SQRT2 = 1.0 / math.sqrt(2.0)


def _gelu(h, approximate):
    if approximate:
        # tanh approximation runs on the EUP (separate VLIW slot) -> effectively free under
        # MXU work, but differs slightly from torch.nn.functional.gelu's exact-erf default.
        return jax.nn.gelu(h, approximate=True)
    return 0.5 * h * (1.0 + lax.erf(h * _INV_SQRT2))


def _ffn_kernel(x_ref, w1_ref, b1_ref, w2_ref, b2_ref, o_ref, acc_ref, *, approximate_gelu):
    # Grid: (rows_p // tm, I // ti). Axis 0 is parallel over row tiles; axis 1 reduces over
    # the intermediate dimension into the f32 accumulator acc_ref.
    j = pl.program_id(1)

    @pl.when(j == 0)
    def _():
        acc_ref[...] = jnp.zeros_like(acc_ref)

    x = x_ref[...]
    h = jnp.dot(x, w1_ref[...], preferred_element_type=jnp.float32) + b1_ref[...]
    h = _gelu(h, approximate_gelu)
    # dropout_rate = 0.0 -> identity (eval semantics); nothing to do.
    # Cast back to the activation dtype so matmul #2 stays a native (e.g. bf16) MXU op;
    # accumulation stays in f32 via preferred_element_type.
    acc_ref[...] += jnp.dot(h.astype(x.dtype), w2_ref[...],
                            preferred_element_type=jnp.float32)

    @pl.when(j == pl.num_programs(1) - 1)
    def _():
        o_ref[...] = (acc_ref[...] + b2_ref[...]).astype(o_ref.dtype)


def _round_up(n, m):
    return ((n + m - 1) // m) * m


def _pick_ti(I, H, weight_itemsize, ti):
    """Intermediate-dim tile: must be a 128-multiple divisor of I, or I itself."""
    if ti is not None:
        ti = min(int(ti), I)
        if ti == I or (ti > 0 and I % ti == 0 and ti % 128 == 0):
            return ti
        return I
    # Auto: keep full I resident unless the two weight slabs would hog VMEM
    # (v7x has only 64 MiB physical VMEM / 32 MiB default scoped).
    if I % 128 == 0 and 2 * H * I * weight_itemsize > (24 << 20):
        for cand in (2048, 1024, 512, 256, 128):
            if I % cand == 0:
                return cand
    return I


def feed_forward1(x, w1, b1, w2, b2, *, tm=256, ti=None,
                  vmem_limit_bytes=None, approximate_gelu=False):
    """x: [rows, H]; w1: [H, I]; b1: [I]; w2: [I, H]; b2: [H] -> [rows, H]."""
    rows, H = x.shape
    I = w1.shape[1]
    act_itemsize = jnp.dtype(x.dtype).itemsize

    # Row tile: as large as possible (fill the MXU, amortize per-step overhead), rounded to
    # the sublane granularity of the activation dtype (8 for f32, 16 for bf16, 32 for int8).
    sublane = {4: 8, 2: 16, 1: 32}.get(act_itemsize, 8)
    tm = max(sublane, min(int(tm), _round_up(rows, sublane)))
    tm = _round_up(tm, sublane)
    rows_p = _round_up(rows, tm)

    ti = _pick_ti(I, H, jnp.dtype(w1.dtype).itemsize, ti)
    n_j = I // ti

    if rows_p != rows:
        x = jnp.pad(x, ((0, rows_p - rows), (0, 0)))

    b1_2d = b1.reshape(1, I)
    b2_2d = b2.reshape(1, H)

    if vmem_limit_bytes is None:
        # Safe on all of v5e/v6e/v7x (v7x has only 64 MiB physical VMEM); can be raised to
        # ~100 MiB on v5e/v6e when sweeping larger tm/ti.
        vmem_limit_bytes = 48 * 1024 * 1024

    def _spec(shape, index_map, *, constant=False):
        if constant:
            # Grid-invariant block: single-buffer it to halve its VMEM footprint.
            return pl.BlockSpec(shape, index_map, pipeline_mode=pl.Buffered(1))
        return pl.BlockSpec(shape, index_map)

    weights_const = (n_j == 1)  # full weights resident -> their block index never changes

    grid_spec = pltpu.PrefetchScalarGridSpec(
        num_scalar_prefetch=0,
        grid=(rows_p // tm, n_j),
        in_specs=[
            _spec((tm, H), lambda i, j: (i, 0)),                          # x tile
            _spec((H, ti), lambda i, j: (0, j), constant=weights_const),  # W1 slab
            _spec((1, ti), lambda i, j: (0, j), constant=weights_const),  # b1 slab
            _spec((ti, H), lambda i, j: (j, 0), constant=weights_const),  # W2 slab
            _spec((1, H), lambda i, j: (0, 0), constant=True),            # b2
        ],
        out_specs=pl.BlockSpec((tm, H), lambda i, j: (i, 0)),
        scratch_shapes=[pltpu.VMEM((tm, H), jnp.float32)],
    )

    out = pl.pallas_call(
        functools.partial(_ffn_kernel, approximate_gelu=approximate_gelu),
        out_shape=jax.ShapeDtypeStruct((rows_p, H), x.dtype),
        grid_spec=grid_spec,
        compiler_params=pltpu.CompilerParams(
            dimension_semantics=("parallel", "arbitrary"),
            vmem_limit_bytes=vmem_limit_bytes,
        ),
    )(x, w1, b1_2d, w2, b2_2d)

    return out[:rows] if rows_p != rows else out


def _reference(x, w1, b1, w2, b2):
    h = x @ w1 + b1
    h = 0.5 * h * (1.0 + lax.erf(h * _INV_SQRT2))
    return h @ w2 + b2


def _make_params(key, H, I, dtype=jnp.float32):
    k1, k2, k3, k4 = jax.random.split(key, 4)
    bound1 = 1.0 / math.sqrt(H)
    w1 = jax.random.uniform(k1, (H, I), minval=-bound1, maxval=bound1, dtype=dtype)
    b1 = jax.random.uniform(k2, (I,), minval=-bound1, maxval=bound1, dtype=dtype)
    bound2 = 1.0 / math.sqrt(I)
    w2 = jax.random.uniform(k3, (I, H), minval=-bound2, maxval=bound2, dtype=dtype)
    b2 = jax.random.uniform(k4, (H,), minval=-bound2, maxval=bound2, dtype=dtype)
    return w1, b1, w2, b2


if __name__ == "__main__":
    key = jax.random.PRNGKey(0)
    k_a, k_b = jax.random.split(key, 2)

    # --- Test 1: toy shapes implied by the module (batch=2, seq=8, H=32, I=64) -----------
    batch, seq, H, I = 2, 8, 32, 64
    kx, kp = jax.random.split(k_a, 2)
    x = jax.random.normal(kx, (batch, seq, H), dtype=jnp.float32)
    w1, b1, w2, b2 = _make_params(kp, H, I)

    x2d = x.reshape(batch * seq, H)
    out = feed_forward1(x2d, w1, b1, w2, b2).reshape(batch, seq, H)
    jax.block_until_ready(out)
    ref = _reference(x2d, w1, b1, w2, b2).reshape(batch, seq, H)
    assert jnp.allclose(out, ref, atol=1e-5, rtol=1e-5), "mismatch vs reference (toy shape)"

    # --- Test 2: 128-aligned shape exercising row padding + intermediate-dim tiling ------
    rows2, H2, I2 = 200, 128, 256  # rows2 % tm != 0 -> padded; I2 tiled with ti=128
    kx2, kp2 = jax.random.split(k_b, 2)
    x2 = jax.random.normal(kx2, (rows2, H2), dtype=jnp.float32)
    w1b, b1b, w2b, b2b = _make_params(kp2, H2, I2)

    out2 = feed_forward1(x2, w1b, b1b, w2b, b2b, tm=128, ti=128)
    jax.block_until_ready(out2)
    ref2 = _reference(x2, w1b, b1b, w2b, b2b)
    assert jnp.allclose(out2, ref2, atol=1e-4, rtol=1e-4), "mismatch vs reference (tiled)"

    print("KERNEL_OK")
</pallas_src>

<mosaic_0001>
module attributes {stable_mosaic.version = 11 : i64} {
  func.func @_ffn_kernel(%arg0: i32, %arg1: i32, %arg2: memref<16x32xf32, #tpu.memory_space<vmem>>, %arg3: memref<32x64xf32, #tpu.memory_space<vmem>>, %arg4: memref<1x64xf32, #tpu.memory_space<vmem>>, %arg5: memref<64x32xf32, #tpu.memory_space<vmem>>, %arg6: memref<1x32xf32, #tpu.memory_space<vmem>>, %arg7: memref<16x32xf32, #tpu.memory_space<vmem>>, %arg8: memref<16x32xf32, #tpu.memory_space<vmem>>) attributes {dimension_semantics = [#tpu.dimension_semantics<parallel>, #tpu.dimension_semantics<arbitrary>], iteration_bounds = array<i64: 1, 1>, scalar_prefetch = 0 : i64, scratch_operands = 1 : i64, tpu.core_type = #tpu.core_type<tc>, window_params = [{transform_indices = @transform_0, window_bounds = array<i64: 16, 32>}, {pipeline_mode = #tpu.pipeline_mode<synchronous>, transform_indices = @transform_1, window_bounds = array<i64: 32, 64>}, {pipeline_mode = #tpu.pipeline_mode<synchronous>, transform_indices = @transform_2, window_bounds = array<i64: 1, 64>}, {pipeline_mode = #tpu.pipeline_mode<synchronous>, transform_indices = @transform_3, window_bounds = array<i64: 64, 32>}, {pipeline_mode = #tpu.pipeline_mode<synchronous>, transform_indices = @transform_4, window_bounds = array<i64: 1, 32>}, {transform_indices = @transform_5, window_bounds = array<i64: 16, 32>}]} {
    %c0_i32 = arith.constant 0 : i32
    %0 = arith.cmpi eq, %arg1, %c0_i32 : i32
    %1 = arith.extui %0 : i1 to i32
    %c0_i32_0 = arith.constant 0 : i32
    %2 = arith.cmpi ne, %1, %c0_i32_0 : i32
    scf.if %2 {
      %cst_18 = arith.constant 0.000000e+00 : f32
      %25 = vector.broadcast %cst_18 : f32 to vector<16x32xf32>
      %c0_19 = arith.constant 0 : index
      %c0_20 = arith.constant 0 : index
      %26 = vector.load %arg8[%c0_19, %c0_20] : memref<16x32xf32, #tpu.memory_space<vmem>>, vector<16x32xf32>
      tpu.vector_store %arg8[%c0_19, %c0_20], %25 {strides = array<i32>} : memref<16x32xf32, #tpu.memory_space<vmem>>, vector<16x32xf32>,
    } else {
    }
    %c0 = arith.constant 0 : index
    %c0_1 = arith.constant 0 : index
    %3 = vector.load %arg2[%c0, %c0_1] : memref<16x32xf32, #tpu.memory_space<vmem>>, vector<16x32xf32>
    %c0_2 = arith.constant 0 : index
    %c0_3 = arith.constant 0 : index
    %4 = vector.load %arg3[%c0_2, %c0_3] : memref<32x64xf32, #tpu.memory_space<vmem>>, vector<32x64xf32>
    %cst = arith.constant dense<0.000000e+00> : vector<16x64xf32>
    %5 = tpu.matmul %3, %4, %cst {dimension_numbers = #tpu.dot_dimension_numbers<[1], [0], [0], [1], [0, 0, 1, 1], [], []>} : vector<16x32xf32>, vector<32x64xf32>, vector<16x64xf32> -> vector<16x64xf32>
    %c0_4 = arith.constant 0 : index
    %c0_5 = arith.constant 0 : index
    %6 = vector.load %arg4[%c0_4, %c0_5] : memref<1x64xf32, #tpu.memory_space<vmem>>, vector<1x64xf32>
    %7 = vector.broadcast %6 : vector<1x64xf32> to vector<16x64xf32>
    %8 = arith.addf %5, %7 : vector<16x64xf32>
    %cst_6 = arith.constant 5.000000e-01 : f32
    %9 = vector.broadcast %cst_6 : f32 to vector<16x64xf32>
    %10 = arith.mulf %9, %8 : vector<16x64xf32>
    %cst_7 = arith.constant 0.707106769 : f32
    %11 = vector.broadcast %cst_7 : f32 to vector<16x64xf32>
    %12 = arith.mulf %8, %11 : vector<16x64xf32>
    %13 = math.erf %12 : vector<16x64xf32>
    %cst_8 = arith.constant 1.000000e+00 : f32
    %14 = vector.broadcast %cst_8 : f32 to vector<16x64xf32>
    %15 = arith.addf %14, %13 : vector<16x64xf32>
    %16 = arith.mulf %10, %15 : vector<16x64xf32>
    %c0_9 = arith.constant 0 : index
    %c0_10 = arith.constant 0 : index
    %17 = vector.load %arg8[%c0_9, %c0_10] : memref<16x32xf32, #tpu.memory_space<vmem>>, vector<16x32xf32>
    %c0_11 = arith.constant 0 : index
    %c0_12 = arith.constant 0 : index
    %18 = vector.load %arg5[%c0_11, %c0_12] : memref<64x32xf32, #tpu.memory_space<vmem>>, vector<64x32xf32>
    %cst_13 = arith.constant dense<0.000000e+00> : vector<16x32xf32>
    %19 = tpu.matmul %16, %18, %cst_13 {dimension_numbers = #tpu.dot_dimension_numbers<[1], [0], [0], [1], [0, 0, 1, 1], [], []>} : vector<16x64xf32>, vector<64x32xf32>, vector<16x32xf32> -> vector<16x32xf32>
    %20 = arith.addf %17, %19 : vector<16x32xf32>
    %c0_14 = arith.constant 0 : index
    %c0_15 = arith.constant 0 : index
    %21 = vector.load %arg8[%c0_14, %c0_15] : memref<16x32xf32, #tpu.memory_space<vmem>>, vector<16x32xf32>
    tpu.vector_store %arg8[%c0_14, %c0_15], %20 {strides = array<i32>} : memref<16x32xf32, #tpu.memory_space<vmem>>, vector<16x32xf32>,
    %c0_i32_16 = arith.constant 0 : i32
    %22 = arith.cmpi eq, %arg1, %c0_i32_16 : i32
    %23 = arith.extui %22 : i1 to i32
    %c0_i32_17 = arith.constant 0 : i32
    %24 = arith.cmpi ne, %23, %c0_i32_17 : i32
    scf.if %24 {
      %c0_18 = arith.constant 0 : index
      %c0_19 = arith.constant 0 : index
      %25 = vector.load %arg8[%c0_18, %c0_19] : memref<16x32xf32, #tpu.memory_space<vmem>>, vector<16x32xf32>
      %c0_20 = arith.constant 0 : index
      %c0_21 = arith.constant 0 : index
      %26 = vector.load %arg6[%c0_20, %c0_21] : memref<1x32xf32, #tpu.memory_space<vmem>>, vector<1x32xf32>
      %27 = vector.broadcast %26 : vector<1x32xf32> to vector<16x32xf32>
      %28 = arith.addf %25, %27 : vector<16x32xf32>
      %c0_22 = arith.constant 0 : index
      %c0_23 = arith.constant 0 : index
      %29 = vector.load %arg7[%c0_22, %c0_23] : memref<16x32xf32, #tpu.memory_space<vmem>>, vector<16x32xf32>
      tpu.vector_store %arg7[%c0_22, %c0_23], %28 {strides = array<i32>} : memref<16x32xf32, #tpu.memory_space<vmem>>, vector<16x32xf32>,
    } else {
    }
    return
  }
  func.func @transform_0(%arg0: i32, %arg1: i32) -> (i32, i32) {
    %c0_i32 = arith.constant 0 : i32
    %c0_i32_0 = arith.constant 0 : i32
    return %arg0, %c0_i32 : i32, i32
  }
  func.func @transform_1(%arg0: i32, %arg1: i32) -> (i32, i32) {
    %c0_i32 = arith.constant 0 : i32
    %c0_i32_0 = arith.constant 0 : i32
    return %c0_i32, %arg1 : i32, i32
  }
  func.func @transform_2(%arg0: i32, %arg1: i32) -> (i32, i32) {
    %c0_i32 = arith.constant 0 : i32
    %c0_i32_0 = arith.constant 0 : i32
    return %c0_i32, %arg1 : i32, i32
  }
  func.func @transform_3(%arg0: i32, %arg1: i32) -> (i32, i32) {
    %c0_i32 = arith.constant 0 : i32
    %c0_i32_0 = arith.constant 0 : i32
    return %arg1, %c0_i32 : i32, i32
  }
  func.func @transform_4(%arg0: i32, %arg1: i32) -> (i32, i32) {
    %c0_i32 = arith.constant 0 : i32
    %c0_i32_0 = arith.constant 0 : i32
    %c0_i32_1 = arith.constant 0 : i32
    return %c0_i32, %c0_i32_0 : i32, i32
  }
  func.func @transform_5(%arg0: i32, %arg1: i32) -> (i32, i32) {
    %c0_i32 = arith.constant 0 : i32
    %c0_i32_0 = arith.constant 0 : i32
    return %arg0, %c0_i32 : i32, i32
  }
}

</mosaic_0001>

<bundles_post_ra>
// kernel: tpu_custom_call.1
= control target key start
LH: loop header
LB: loop body
LE: loop exit
PB: predicated region body
PF: predicated region fallthrough
CT: control target
= control target key end

     0   :  { %vm25_vm0 = vcmask 261120   ;;  %s471_s0 = inlined_call_operand.vmem [shape: f32[16,32], index: 0, kind: input, shape index: {}]   ;;  %s472_s1 = inlined_call_operand.vmem [shape: f32[32,64], index: 1, kind: input, shape index: {}]   ;;  %s473_s2 = inlined_call_operand.vmem [shape: f32[1,64], index: 2, kind: input, shape index: {}]   ;;  %s474_s3 = inlined_call_operand.vmem [shape: f32[64,32], index: 3, kind: input, shape index: {}]   ;;  %s475_s4 = inlined_call_operand.vmem [shape: f32[1,32], index: 4, kind: input, shape index: {}]   ;;  %s476_s5 = inlined_call_operand.hbm [shape: f32[16,32], index: 5, kind: output, shape index: {}]  }
   0x1   :  { %v30_v0 = vld [vmem:[%s472_s1] sm:$0xff]  ;;  %v31_v1 = vld [vmem:[%s472_s1 + $0x8] sm:$0xff]  ;;  %v32_v2 = vld [vmem:[%s472_s1 + $0x10] sm:$0xff] }
   0x2   :  { %v313_v3 = vpack.c.bf16 %v31_v1, %v30_v0  ;;  %v33_v4 = vld [vmem:[%s472_s1 + $0x18] sm:$0xff]  ;;  %v28_v5 = vld [vmem:[%s471_s0] sm:$0xff] }
   0x3   :  { %v317_v6 = vpack.c.bf16 %v33_v4, %v32_v2  ;;  %291 = vmatprep.mubr.msk.f32.mxu0 %vm25_vm0, %v28_v5 }
   0x4   :  { %10 = vsyncpa [#allocation4], 0  ;;  %314 = vmatprep.subr.bf16.mxu0 %v313_v3  ;;  %v29_v7 = vld [vmem:[%s471_s0 + $0x8] sm:$0xff]  ;;  %v135_v8 = vld [vmem:[%s474_s3] sm:$0xff]  ;;  %v369_v20 = vmov 0.0   ;;  %vm143_vm1 = vcmask 523264  }
   0x5   :  { %316 = vmatpush3.bf16.msra.mxu0 %v313_v3  ;;  %v136_v9 = vld [vmem:[%s474_s3 + $0x8] sm:$0xff]  ;;  %v137_v11 = vld [vmem:[%s474_s3 + $0x10] sm:$0xff]  ;;  %v138_v12 = vld [vmem:[%s474_s3 + $0x18] sm:$0xff]  ;;  %27 = vst.msk [vmem:[#allocation2 + $0x8] sm:$0xff] %vm25_vm0, %v369_v20  ;;  %s370_s21 = smov [#allocation3]  }
   0x6   :  { %318 = vmatprep.subr.bf16.mxu0 %v317_v6  ;;  %v321_v10 = vpack.c.bf16 %v136_v9, %v135_v8  ;;  %v325_v13 = vpack.c.bf16 %v138_v12, %v137_v11  ;;  %v139_v14 = vld [vmem:[%s474_s3 + $0x20] sm:$0xff]  ;;  %v140_v15 = vld [vmem:[%s474_s3 + $0x28] sm:$0xff]  ;;  %v141_v17 = vld [vmem:[%s474_s3 + $0x30] sm:$0xff]  ;;  %26 = vst.msk [vmem:[#allocation2] sm:$0xff] %vm25_vm0, %v369_v20  ;;  %s250_s22 = sshll.u32 %s370_s21, 4  ;;  %s251_s22 = int_to_ptr.vmem [resolvable:$true] %s250_s22 }
   0x7   :  { %v329_v16 = vpack.c.bf16 %v140_v15, %v139_v14  ;;  %v142_v18 = vld [vmem:[%s474_s3 + $0x38] sm:$0xff]  ;;  %v261_v21 = vld [vmem:[%s473_s2] ss:$0 sm:$0xff]  ;;  %s345_s23 = scalar_lea.vmem %s251_s22, 256  ;;  %p350_p1 = scmp.lt.s32.totalorder %s251_s22, %s251_s22 }
   0x8   :  { %322 = vmatprep.subr.bf16.mxu1 %v321_v10  ;;  %v333_v19 = vpack.c.bf16 %v142_v18, %v141_v17  ;;  %v266_v42 = vld [vmem:[%s475_s4] ss:$0 sm:$0xff]  ;;  %p346_p0 = scmp.ne.s32.totalorder %s251_s22, %s345_s23  ;;  %p351_p2 = scmp.lt.s32.totalorder %s345_s23, %s345_s23 }
   0x9   :  { %320 = vmatpush3.bf16.msra.mxu0 %v317_v6  ;;  %324 = vmatpush3.bf16.msra.mxu1 %v321_v10 }
   0xa   :  { %326 = vmatprep.subr.bf16.mxu1 %v325_v13  ;;  %p352_p3 = por %p351_p2, %p350_p1 }
   0xc   :  { %292 = vmatmul.mubr.msk.f32.vlgmr.msra.gmra.mrb[0].mxu0 %vm25_vm0, %v29_v7  ;;  %v134_v36 = vld [vmem:[#allocation2 + $0x8] sm:$0xff]  ;;  %p353_p4 = pnand %p352_p3, %p346_p0 }
   0xd   :  { %328 = vmatpush3.bf16.msra.mxu1 %v325_v13  ;;  %v133_v37 = vld [vmem:[#allocation2] sm:$0xff] }
   0xe   :  { %330 = vmatprep.subr.bf16.mxu1 %v329_v16 }
  0x11   :  { %332 = vmatpush3.bf16.msra.mxu1 %v329_v16 }
  0x12   :  { %334 = vmatprep.subr.bf16.mxu1 %v333_v19 }
  0x15   :  { %336 = vmatpush3.bf16.msra.mxu1 %v333_v19 }
  0xdf   :  { %v293_v22 = vpop.f32.mrb[0].mxu0 }
  0xe0   :  { %v120_v23 = vadd.f32 %v293_v22, %v261_v21  ;;  %v114_v24 = vpop.f32.mrb[1].mxu0 }
  0xe1   :  { %v115_v25 = vadd.f32 %v261_v21, %v114_v24 }
  0xe2   :  { %v126_v26 = vmul.f32 0.70710677, %v120_v23  ;;  %v124_v33 = vmul.f32 0.5, %v120_v23 }
  0xe3   :  { %v125_v27 = vmul.f32 0.70710677, %v115_v25  ;;  %v123_v31 = vmul.f32 0.5, %v115_v25 }
  0xe4   :  { %341 = verf.f32 %v126_v26 }
  0xe5   :  { %343 = verf.f32 %v125_v27 }
  0xee   :  { %v342_v28 = vpop.eup %341 }
  0xef   :  { %v344_v29 = vpop.eup %343  ;;  %v130_v30 = vadd.f32 1.0, %v342_v28 }
  0xf0   :  { %v129_v32 = vadd.f32 1.0, %v344_v29 }
  0xf1   :  { %v132_v35 = vmul.f32 %v130_v30, %v124_v33 }
  0xf2   :  { %v131_v34 = vmul.f32 %v129_v32, %v123_v31 }
  0xf4   :  { %310 = vmatprep.mubr.msk.f32.mxu1 %vm143_vm1, %v131_v34 }
  0xf5   :  { %311 = vmatmul.mubr.msk.f32.vlgmr.msra.gmra.mrb[0].mxu1 %vm143_vm1, %v132_v35 }
 0x1c8   :  { %v312_v38 = vpop.f32.mrb[0].mxu1 }
 0x1c9   :  { %v226_v39 = vadd.f32 %v312_v38, %v134_v36  ;;  %v216_v40 = vpop.f32.mrb[1].mxu1 }
 0x1ca   :  { %v225_v41 = vadd.f32 %v216_v40, %v133_v37 }
 0x1cb   :  { %228 = vst.msk [vmem:[#allocation2 + $0x8] sm:$0xff] %vm25_vm0, %v226_v39 }
 0x1cc   :  { %227 = vst.msk [vmem:[#allocation2] sm:$0xff] %vm25_vm0, %v225_v41 }
 0x1d2   :  { %v233_v43 = vld [vmem:[#allocation2 + $0x8] sm:$0xff] }
 0x1d3   :  { %v232_v44 = vld [vmem:[#allocation2] sm:$0xff]  ;;  %v242_v45 = vadd.f32 %v266_v42, %v233_v43 }
 0x1d4   :  { %v241_v46 = vadd.f32 %v266_v42, %v232_v44 }
 0x1d5   :  { %244 = vst.msk [vmem:[#allocation3 + $0x8] sm:$0xff] %vm25_vm0, %v242_v45 }
 0x1d6   :  { %243 = vst.msk [vmem:[#allocation3] sm:$0xff] %vm25_vm0, %v241_v46 }
 0x1d7   :  { %356 = shalt.err (!%p353_p4)
}
 0x1d8   :  { %s357_s25 = scalar_lea.hbm %s476_s5, 256 }
 0x1d9   :  { %p358_p5 = scmp.ne.s32.totalorder %s476_s5, %s357_s25  ;;  %p361_p6 = scmp.lt.u32.totalorder %s357_s25, %s476_s5 }
 0x1db   :  { %p363_p7 = pnand %p361_p6, %p358_p5 }
 0x1dd   :  { %366 = shalt.err (!%p363_p7)
}
 0x1de   :  { %s371_s30 = smov 128   ;;  %s372_s1 = smov 8  }
 0x1df   :  { %256 = dma.vmem_to_hbm [thread:$0]  %s251_s22, 256, %s476_s5, [#allocation4], %s371_s30, %s371_s30, %s372_s1  }
 0x1e0   :  { %367 = dma.done.wait [#allocation4], 256  }
 0x1e1   :  { %368 = vsyncadd [#allocation4], 4294967040 }
 0x1e2   :  { %260 = vsyncpa [#allocation4], 1 }

</bundles_post_ra>
